<compile_context>
chip_gen: v7x
topology: tpu7x:2x2x1
jax: 0.10.0
libtpu: 0.0.40
codegen_flags: <defaults>
</compile_context>

<pallas_src>
import functools

import jax
import jax.numpy as jnp
from jax.experimental import pallas as pl
from jax.experimental.pallas import tpu as pltpu


_BUF_BUDGET = 8 * 1024 * 1024    # target bytes per pipeline buffer (feature block)
_VMEM_LIMIT = 48 * 1024 * 1024   # scoped VMEM: fits v7x 64 MiB/TC, v5e/v6e 128 MiB


def _round_up(x, m):
    return ((x + m - 1) // m) * m


# ---------------------------------------------------------------------------
# Path A: batch-blocked, lane-dense 2-D layout (general case).
# ---------------------------------------------------------------------------
def _agg_kernel_batch(w_ref, f_ref, coord_ref, out_ref, *, c, hw_p):
    """One grid step = one block of b_blk batch rows.

    w_ref     : SMEM (C,) f32     feature-channel weights of the 1x1 conv
    f_ref     : VMEM (B, C*HWp)   features; channel k lives in lanes
                                  [k*HWp, (k+1)*HWp) -> every vreg is dense
    coord_ref : VMEM (1, HWp) f32 constant plane w_x*x + w_y*y + bias
                                  (padded lanes hold -1e30 so sigmoid == 0)
    out_ref   : VMEM (B, C)       aggregated feature vectors
    """
    coord = coord_ref[...]                                    # (1, HWp)

    def chan(k):
        # Static, 128-aligned lane slice.  Per-slice f32 upcast bounds the
        # live range (matters for bf16 inputs, esp. on v5e).
        return f_ref[:, k * hw_p:(k + 1) * hw_p].astype(jnp.float32)

    # logits = coord + sum_k w_k * f_k  -- unrolled: C pure-VPU FMAs with SMEM
    # scalar multipliers, no cross-sublane reduce.  Single broadcast of coord.
    acc = w_ref[0] * chan(0)
    for k in range(1, c):
        acc = acc + w_ref[k] * chan(k)
    a_map = jax.nn.sigmoid(acc + coord)                       # (B, HWp)

    denom = jnp.sum(a_map, axis=-1, keepdims=True)            # (B, 1)
    nums = [jnp.sum(chan(k) * a_map, axis=-1, keepdims=True) for k in range(c)]
    num = jnp.concatenate(nums, axis=-1)                      # (B, C)
    # Exact division, matching the PyTorch module (the reciprocal is over only
    # (B, 1) elements, so the approximate EUP path saved nothing).
    out_ref[...] = (num / denom).astype(out_ref.dtype)


def _agg_batch_blocked(f_map, w_feat, coord, n, c, hw, hw_p, itemsize):
    # Flatten C and HW onto the lane axis: channel k occupies lanes
    # [k*HWp, (k+1)*HWp).  Pure metadata when HW % 128 == 0.
    # TODO(synk): for HW % 128 != 0 this pad costs an extra HBM pass; an
    # in-kernel iota mask on the tail lanes would avoid it.
    if hw_p != hw:
        f3 = jnp.pad(f_map.reshape(n, c, hw), ((0, 0), (0, 0), (0, hw_p - hw)))
        f_flat = f3.reshape(n, c * hw_p)
        coord = jnp.pad(coord, ((0, 0), (0, hw_p - hw)), constant_values=-1e30)
    else:
        f_flat = f_map.reshape(n, c * hw)

    # Block sizing: the 2-D layout has no sublane waste, so the VMEM block is
    # exactly b_blk * C * HWp * itemsize.  Aim for >= ~16 grid steps (>= 8 per
    # v7x TensorCore) while keeping each pipeline buffer around 8 MiB.  b_blk
    # is a multiple of 8 (or the full batch) so the (b_blk, C) output block is
    # sublane-aligned.
    row_bytes = c * hw_p * itemsize
    max_blk = max(1, _BUF_BUDGET // row_bytes)
    if n <= 8:
        b_blk = n
    else:
        b_blk = min(max_blk, max(8, pl.cdiv(n, 16)))
        b_blk = max(8, (b_blk // 8) * 8)
    grid_n = pl.cdiv(n, b_blk)

    kernel = functools.partial(_agg_kernel_batch, c=c, hw_p=hw_p)
    return pl.pallas_call(
        kernel,
        out_shape=jax.ShapeDtypeStruct((n, c), f_map.dtype),
        grid_spec=pltpu.PrefetchScalarGridSpec(
            num_scalar_prefetch=0,
            grid=(grid_n,),
            in_specs=[
                pl.BlockSpec(memory_space=pltpu.MemorySpace.SMEM),   # (C,) weights
                pl.BlockSpec((b_blk, c * hw_p), lambda i: (i, 0)),
                pl.BlockSpec((1, hw_p), lambda i: (0, 0)),           # loaded once
            ],
            out_specs=pl.BlockSpec((b_blk, c), lambda i: (i, 0)),
        ),
        compiler_params=pltpu.CompilerParams(
            dimension_semantics=("parallel",),
            vmem_limit_bytes=_VMEM_LIMIT),
    )(w_feat, f_flat, coord)


# ---------------------------------------------------------------------------
# Path B: HW-tiled accumulator (small batch and/or huge per-row spatial size).
# ---------------------------------------------------------------------------
def _agg_kernel_hw_tiled(wv_ref, f_ref, coord_ref, out_ref, num_acc, den_acc):
    """grid = (batch blocks, HW tiles); the HW axis is the reduction axis.

    wv_ref    : VMEM (C, 1) f32    f_ref  : VMEM (B, C, HWt)
    coord_ref : VMEM (1, HWt) f32  out_ref: VMEM (B, C)
    num_acc   : VMEM (B, C) f32    den_acc: VMEM (B, 1) f32
    """
    j = pl.program_id(1)

    @pl.when(j == 0)
    def _():
        num_acc[...] = jnp.zeros_like(num_acc)
        den_acc[...] = jnp.zeros_like(den_acc)

    f = f_ref[...].astype(jnp.float32)                        # (B, C, HWt)
    wv = wv_ref[...]                                          # (C, 1)
    coord = coord_ref[...]                                    # (1, HWt)
    logits = jnp.sum(f * wv[None, :, :], axis=1) + coord      # (B, HWt)
    a_map = jax.nn.sigmoid(logits)
    num_acc[...] += jnp.sum(f * a_map[:, None, :], axis=-1)   # (B, C)
    den_acc[...] += jnp.sum(a_map, axis=-1, keepdims=True)    # (B, 1)

    @pl.when(j == pl.num_programs(1) - 1)
    def _():
        out_ref[...] = (num_acc[...] / den_acc[...]).astype(out_ref.dtype)


def _agg_hw_tiled(f_map, w_feat, coord, n, c, hw, itemsize, hw_block):
    c_pad = _round_up(c, 8)              # sublane padding of C in the VMEM tile
    b_blk = n if n <= 8 else 8           # (b_blk, C) out block: full batch or 8-aligned
    if hw_block is not None:
        hw_t = min(_round_up(hw_block, 128), _round_up(hw, 128))
    else:
        hw_t = max(128, (_BUF_BUDGET // (b_blk * c_pad * itemsize)) // 128 * 128)
        hw_t = min(hw_t, _round_up(hw, 128))
        # Prefer >= ~8 pipelined HW steps when the data allows it.
        hw_t = min(hw_t, max(128, _round_up(pl.cdiv(hw, 8), 128)))
    grid_hw = pl.cdiv(hw, hw_t)
    hw_p = grid_hw * hw_t

    f3 = f_map.reshape(n, c, hw)
    if hw_p != hw:
        f3 = jnp.pad(f3, ((0, 0), (0, 0), (0, hw_p - hw)))
        coord = jnp.pad(coord, ((0, 0), (0, hw_p - hw)), constant_values=-1e30)
    wv_col = w_feat.reshape(c, 1)

    return pl.pallas_call(
        _agg_kernel_hw_tiled,
        out_shape=jax.ShapeDtypeStruct((n, c), f_map.dtype),
        grid_spec=pltpu.PrefetchScalarGridSpec(
            num_scalar_prefetch=0,
            grid=(pl.cdiv(n, b_blk), grid_hw),
            in_specs=[
                pl.BlockSpec((c, 1), lambda i, j: (0, 0)),
                pl.BlockSpec((b_blk, c, hw_t), lambda i, j: (i, 0, j)),
                pl.BlockSpec((1, hw_t), lambda i, j: (0, j)),
            ],
            out_specs=pl.BlockSpec((b_blk, c), lambda i, j: (i, 0)),
            scratch_shapes=[pltpu.VMEM((b_blk, c), jnp.float32),
                            pltpu.VMEM((b_blk, 1), jnp.float32)],
        ),
        compiler_params=pltpu.CompilerParams(
            dimension_semantics=("parallel", "arbitrary"),
            vmem_limit_bytes=_VMEM_LIMIT),
    )(wv_col, f3, coord)


# ---------------------------------------------------------------------------
# Public wrapper.
# ---------------------------------------------------------------------------
def agg_block_v2(f_map, conv_w, conv_b, *, hw_block=None):
    """AggBlockv2 forward.

    f_map   : (N, C, H, W) float32 or bfloat16 (bf16 halves HBM traffic; the
              kernel still accumulates in f32).
    conv_w  : (1, C+2, 1, 1) Conv2d(in_ch+2, 1, 1) weight, channel order (f, x, y).
    conv_b  : (1,) bias.
    hw_block: optional lane-tile size forcing the HW-tiled accumulator path
              (normally selected automatically).
    Returns (N, C) attention-weighted spatial mean, dtype of f_map.
    """
    n, c, h, w = f_map.shape
    hw = h * w
    itemsize = jnp.dtype(f_map.dtype).itemsize

    # TODO(synk): ut.make_yx is not provided upstream; assume normalized
    # meshgrid coordinates in [-1, 1], concatenated as (f, x, y) on channels.
    ys = jnp.linspace(-1.0, 1.0, h, dtype=jnp.float32)
    xs = jnp.linspace(-1.0, 1.0, w, dtype=jnp.float32)
    yg, xg = jnp.meshgrid(ys, xs, indexing="ij")

    wv = conv_w.reshape(c + 2).astype(jnp.float32)
    w_feat = wv[:c]                                           # (C,) feature weights
    # Fold coordinate channels + bias of the 1x1 conv into one constant plane,
    # so the (N, C+2, HW) concat never exists in HBM.
    coord = (wv[c] * xg + wv[c + 1] * yg).reshape(1, hw) \
        + conv_b.reshape(1, 1).astype(jnp.float32)

    hw_128 = _round_up(hw, 128)
    if hw_block is not None:
        use_hw_tiling = True
    elif n <= 8:
        # Tiny batch: batch blocking alone gives a 1-step grid (no DMA
        # pipelining, one idle TensorCore on v7x).  If each row carries enough
        # data, tile the spatial axis and accumulate instead.
        use_hw_tiling = c * hw * itemsize >= (1 << 20)
    else:
        # Large batch: batch blocking suffices unless fewer than 8 rows fit the
        # per-buffer budget (the (b_blk, C) output block needs b_blk % 8 == 0).
        use_hw_tiling = 8 * c * hw_128 * itemsize > _BUF_BUDGET

    if use_hw_tiling:
        return _agg_hw_tiled(f_map, w_feat, coord, n, c, hw, itemsize, hw_block)
    return _agg_batch_blocked(f_map, w_feat, coord, n, c, hw, hw_128, itemsize)


def agg_block_v2_ref(f_map, conv_w, conv_b):
    """Pure-JAX reference reproducing the PyTorch forward."""
    n, c, h, w = f_map.shape
    ys = jnp.linspace(-1.0, 1.0, h, dtype=jnp.float32)
    xs = jnp.linspace(-1.0, 1.0, w, dtype=jnp.float32)
    yg, xg = jnp.meshgrid(ys, xs, indexing="ij")
    x_ch = jnp.broadcast_to(xg[None, None], (n, 1, h, w))
    y_ch = jnp.broadcast_to(yg[None, None], (n, 1, h, w))
    f2 = jnp.concatenate([f_map.astype(jnp.float32), x_ch, y_ch], axis=1)
    wv = conv_w.reshape(1, c + 2, 1, 1).astype(jnp.float32)
    a = jax.nn.sigmoid(jnp.sum(f2 * wv, axis=1, keepdims=True)
                       + conv_b.reshape(1, 1, 1, 1).astype(jnp.float32))
    denom = jnp.sum(a, axis=(2, 3))                            # (N, 1)
    num = jnp.sum(f_map.astype(jnp.float32) * a, axis=(2, 3))  # (N, C)
    return num / denom


if __name__ == "__main__":
    key = jax.random.PRNGKey(0)
    k1, k2, k3 = jax.random.split(key, 3)

    def make_inputs(n, c, h, w, dtype=jnp.float32):
        f = jax.random.normal(k1, (n, c, h, w), dtype=jnp.float32).astype(dtype)
        cw = 0.1 * jax.random.normal(k2, (1, c + 2, 1, 1), dtype=jnp.float32)
        cb = 0.1 * jax.random.normal(k3, (1,), dtype=jnp.float32)
        return f, cw, cb

    # 1) Tiny batch -> single-step batch-blocked path (lane-dense 2-D layout).
    f, cw, cb = make_inputs(2, 4, 16, 16)
    out = jax.block_until_ready(agg_block_v2(f, cw, cb))
    ref = agg_block_v2_ref(f, cw, cb)
    assert out.shape == (2, 4), out.shape
    assert jnp.allclose(out, ref, atol=1e-4, rtol=1e-4), (out, ref)

    # 2) HW-tiled accumulator path (what small-N / large-HW shapes use),
    #    forced here at a small size via hw_block.
    f, cw, cb = make_inputs(2, 4, 32, 32)
    out = jax.block_until_ready(agg_block_v2(f, cw, cb, hw_block=256))
    ref = agg_block_v2_ref(f, cw, cb)
    assert jnp.allclose(out, ref, atol=1e-4, rtol=1e-4), (out, ref)

    # 3) Multi-step batch-blocked path with a partial trailing block, bf16 input.
    f, cw, cb = make_inputs(12, 4, 16, 16, dtype=jnp.bfloat16)
    out = jax.block_until_ready(agg_block_v2(f, cw, cb))
    ref = agg_block_v2_ref(f, cw, cb)
    assert jnp.allclose(out.astype(jnp.float32), ref, atol=2e-2, rtol=2e-2), (out, ref)

    print("KERNEL_OK")
</pallas_src>

<mosaic_0001>
module attributes {stable_mosaic.version = 11 : i64} {
  func.func @_agg_kernel_batch(%arg0: i32, %arg1: memref<4xf32, #tpu.memory_space<smem>>, %arg2: memref<2x1024xf32, #tpu.memory_space<vmem>>, %arg3: memref<1x256xf32, #tpu.memory_space<vmem>>, %arg4: memref<2x4xf32, #tpu.memory_space<vmem>>) attributes {dimension_semantics = [#tpu.dimension_semantics<parallel>], iteration_bounds = array<i64: 1>, scalar_prefetch = 0 : i64, scratch_operands = 0 : i64, tpu.core_type = #tpu.core_type<tc>, window_params = [{transform_indices = @transform_0, window_bounds = array<i64: 4>}, {transform_indices = @transform_1, window_bounds = array<i64: 2, 1024>}, {pipeline_mode = #tpu.pipeline_mode<synchronous>, transform_indices = @transform_2, window_bounds = array<i64: 1, 256>}, {transform_indices = @transform_3, window_bounds = array<i64: 2, 4>}]} {
    %c0 = arith.constant 0 : index
    %c0_0 = arith.constant 0 : index
    %0 = vector.load %arg3[%c0, %c0_0] : memref<1x256xf32, #tpu.memory_space<vmem>>, vector<1x256xf32>
    %c0_1 = arith.constant 0 : index
    %1 = memref.load %arg1[%c0_1] : memref<4xf32, #tpu.memory_space<smem>>
    %c0_2 = arith.constant 0 : index
    %c0_3 = arith.constant 0 : index
    %2 = vector.load %arg2[%c0_2, %c0_3] : memref<2x1024xf32, #tpu.memory_space<vmem>>, vector<2x256xf32>
    %3 = vector.broadcast %1 : f32 to vector<2x256xf32>
    %4 = arith.mulf %3, %2 : vector<2x256xf32>
    %c1 = arith.constant 1 : index
    %5 = memref.load %arg1[%c1] : memref<4xf32, #tpu.memory_space<smem>>
    %c0_4 = arith.constant 0 : index
    %c256 = arith.constant 256 : index
    %6 = vector.load %arg2[%c0_4, %c256] : memref<2x1024xf32, #tpu.memory_space<vmem>>, vector<2x256xf32>
    %7 = vector.broadcast %5 : f32 to vector<2x256xf32>
    %8 = arith.mulf %7, %6 : vector<2x256xf32>
    %9 = arith.addf %4, %8 : vector<2x256xf32>
    %c2 = arith.constant 2 : index
    %10 = memref.load %arg1[%c2] : memref<4xf32, #tpu.memory_space<smem>>
    %c0_5 = arith.constant 0 : index
    %c512 = arith.constant 512 : index
    %11 = vector.load %arg2[%c0_5, %c512] : memref<2x1024xf32, #tpu.memory_space<vmem>>, vector<2x256xf32>
    %12 = vector.broadcast %10 : f32 to vector<2x256xf32>
    %13 = arith.mulf %12, %11 : vector<2x256xf32>
    %14 = arith.addf %9, %13 : vector<2x256xf32>
    %c3 = arith.constant 3 : index
    %15 = memref.load %arg1[%c3] : memref<4xf32, #tpu.memory_space<smem>>
    %c0_6 = arith.constant 0 : index
    %c768 = arith.constant 768 : index
    %16 = vector.load %arg2[%c0_6, %c768] : memref<2x1024xf32, #tpu.memory_space<vmem>>, vector<2x256xf32>
    %17 = vector.broadcast %15 : f32 to vector<2x256xf32>
    %18 = arith.mulf %17, %16 : vector<2x256xf32>
    %19 = arith.addf %14, %18 : vector<2x256xf32>
    %20 = vector.broadcast %0 : vector<1x256xf32> to vector<2x256xf32>
    %21 = arith.addf %19, %20 : vector<2x256xf32>
    %22 = arith.negf %21 : vector<2x256xf32>
    %23 = math.exp %22 : vector<2x256xf32>
    %cst = arith.constant 1.000000e+00 : f32
    %24 = vector.broadcast %cst : f32 to vector<2x256xf32>
    %25 = arith.addf %24, %23 : vector<2x256xf32>
    %26 = arith.divf %24, %25 : vector<2x256xf32>
    %cst_7 = arith.constant dense<0.000000e+00> : vector<2xf32>
    %27 = vector.multi_reduction <add>, %26, %cst_7 [1] : vector<2x256xf32> to vector<2xf32>
    %28 = vector.shape_cast %27 : vector<2xf32> to vector<2x1xf32>
    %c0_8 = arith.constant 0 : index
    %c0_9 = arith.constant 0 : index
    %29 = vector.load %arg2[%c0_8, %c0_9] : memref<2x1024xf32, #tpu.memory_space<vmem>>, vector<2x256xf32>
    %30 = arith.mulf %29, %26 : vector<2x256xf32>
    %cst_10 = arith.constant dense<0.000000e+00> : vector<2xf32>
    %31 = vector.multi_reduction <add>, %30, %cst_10 [1] : vector<2x256xf32> to vector<2xf32>
    %32 = vector.shape_cast %31 : vector<2xf32> to vector<2x1xf32>
    %c0_11 = arith.constant 0 : index
    %c256_12 = arith.constant 256 : index
    %33 = vector.load %arg2[%c0_11, %c256_12] : memref<2x1024xf32, #tpu.memory_space<vmem>>, vector<2x256xf32>
    %34 = arith.mulf %33, %26 : vector<2x256xf32>
    %cst_13 = arith.constant dense<0.000000e+00> : vector<2xf32>
    %35 = vector.multi_reduction <add>, %34, %cst_13 [1] : vector<2x256xf32> to vector<2xf32>
    %36 = vector.shape_cast %35 : vector<2xf32> to vector<2x1xf32>
    %c0_14 = arith.constant 0 : index
    %c512_15 = arith.constant 512 : index
    %37 = vector.load %arg2[%c0_14, %c512_15] : memref<2x1024xf32, #tpu.memory_space<vmem>>, vector<2x256xf32>
    %38 = arith.mulf %37, %26 : vector<2x256xf32>
    %cst_16 = arith.constant dense<0.000000e+00> : vector<2xf32>
    %39 = vector.multi_reduction <add>, %38, %cst_16 [1] : vector<2x256xf32> to vector<2xf32>
    %40 = vector.shape_cast %39 : vector<2xf32> to vector<2x1xf32>
    %c0_17 = arith.constant 0 : index
    %c768_18 = arith.constant 768 : index
    %41 = vector.load %arg2[%c0_17, %c768_18] : memref<2x1024xf32, #tpu.memory_space<vmem>>, vector<2x256xf32>
    %42 = arith.mulf %41, %26 : vector<2x256xf32>
    %cst_19 = arith.constant dense<0.000000e+00> : vector<2xf32>
    %43 = vector.multi_reduction <add>, %42, %cst_19 [1] : vector<2x256xf32> to vector<2xf32>
    %44 = vector.shape_cast %43 : vector<2xf32> to vector<2x1xf32>
    %45 = tpu.concatenate %32, %36, %40, %44 in 1 : vector<2x1xf32>, vector<2x1xf32>, vector<2x1xf32>, vector<2x1xf32> -> vector<2x4xf32>
    %46 = vector.broadcast %28 : vector<2x1xf32> to vector<2x4xf32>
    %47 = arith.divf %45, %46 : vector<2x4xf32>
    %c0_20 = arith.constant 0 : index
    %c0_21 = arith.constant 0 : index
    %48 = vector.load %arg4[%c0_20, %c0_21] : memref<2x4xf32, #tpu.memory_space<vmem>>, vector<2x4xf32>
    tpu.vector_store %arg4[%c0_20, %c0_21], %47 {strides = array<i32>} : memref<2x4xf32, #tpu.memory_space<vmem>>, vector<2x4xf32>,
    return
  }
  func.func @transform_0(%arg0: i32) -> i32 {
    %c0_i32 = arith.constant 0 : i32
    %c0_i32_0 = arith.constant 0 : i32
    return %c0_i32 : i32
  }
  func.func @transform_1(%arg0: i32) -> (i32, i32) {
    %c0_i32 = arith.constant 0 : i32
    %c0_i32_0 = arith.constant 0 : i32
    return %arg0, %c0_i32 : i32, i32
  }
  func.func @transform_2(%arg0: i32) -> (i32, i32) {
    %c0_i32 = arith.constant 0 : i32
    %c0_i32_0 = arith.constant 0 : i32
    %c0_i32_1 = arith.constant 0 : i32
    return %c0_i32, %c0_i32_0 : i32, i32
  }
  func.func @transform_3(%arg0: i32) -> (i32, i32) {
    %c0_i32 = arith.constant 0 : i32
    %c0_i32_0 = arith.constant 0 : i32
    return %arg0, %c0_i32 : i32, i32
  }
}

</mosaic_0001>

<bundles_post_ra>
// kernel: tpu_custom_call.1
= control target key start
LH: loop header
LB: loop body
LE: loop exit
PB: predicated region body
PF: predicated region fallthrough
CT: control target
= control target key end

     0   :  { %8 = vsyncpa [#allocation5], 0  ;;  %s341_s0 = inlined_call_operand.hbm [shape: f32[4], index: 0, kind: input, shape index: {}]   ;;  %s342_s1 = inlined_call_operand.hbm [shape: f32[2,1024], index: 1, kind: input, shape index: {}]   ;;  %s343_s2 = inlined_call_operand.vmem [shape: f32[1,256], index: 2, kind: input, shape index: {}]   ;;  %s344_s3 = inlined_call_operand.hbm [shape: f32[2,4], index: 3, kind: output, shape index: {}]  }
   0x1   :  { %9 = vsyncpa [#allocation3], 0 }
   0x2   :  { %10 = vsyncpa [#allocation4], 0  ;;  %s208_s14 = scalar_lea.hbm %s341_s0, 16 }
   0x3   :  { %p209_p0 = scmp.ne.s32.totalorder %s341_s0, %s208_s14  ;;  %p212_p1 = scmp.lt.u32.totalorder %s208_s14, %s341_s0 }
   0x5   :  { %p214_p2 = pnand %p212_p1, %p209_p0 }
   0x7   :  { %217 = shalt.err (!%p214_p2)
}
   0x8   :  { %s268_s19 = smov [#allocation2]   ;;  %s269_s22 = smov [#allocation6]  }
   0x9   :  { %18 = dma.hbm_to_smem %s341_s0, 16, %s268_s19, [#allocation5]  }
   0xa   :  { %s25_s23 = sshll.u32 %s269_s22, 4  ;;  %s218_s26 = scalar_lea.hbm %s342_s1, 256  ;;  %s26_s23 = int_to_ptr.vmem [resolvable:$true] %s25_s23 }
   0xb   :  { %p219_p3 = scmp.ne.s32.totalorder %s342_s1, %s218_s26  ;;  %p222_p4 = scmp.lt.u32.totalorder %s218_s26, %s342_s1 }
   0xd   :  { %p224_p5 = pnand %p222_p4, %p219_p3 }
   0xf   :  { %227 = shalt.err (!%p224_p5)
}
  0x10   :  { %s228_s4 = scalar_lea.vmem %s26_s23, 256  ;;  %p233_p7 = scmp.lt.s32.totalorder %s26_s23, %s26_s23 }
  0x11   :  { %p229_p6 = scmp.ne.s32.totalorder %s26_s23, %s228_s4  ;;  %p234_p8 = scmp.lt.s32.totalorder %s228_s4, %s228_s4 }
  0x13   :  { %p235_p9 = por %p234_p8, %p233_p7 }
  0x15   :  { %p236_p10 = pnand %p235_p9, %p229_p6 }
  0x17   :  { %239 = shalt.err (!%p236_p10)
}
  0x18   :  { %28 = dma.hbm_to_vmem [thread:$0]  %s342_s1, 256, %s26_s23, [#allocation3]  }
  0x19   :  { %262 = dma.done.wait [#allocation5], 16  }
  0x1a   :  { %263 = vsyncadd [#allocation5], 4294967280 }
  0x1b   :  { %264 = dma.done.wait [#allocation3], 256  }
  0x1c   :  { %265 = vsyncadd [#allocation3], 4294967040 }
  0x1d   :  { %37 = sfence }
  0x1e   :  { %s39_s6 = sld [smem:[#allocation2]]  ;;  %v59_v0 = vlaneseq  ;;  %s194_s7 = sld [smem:[#allocation2 + $0x1]]  ;;  %v38_v2 = vld [vmem:[%s343_s2] sm:$0x3]  ;;  %v40_v3 = vld [vmem:[#allocation6] sm:$0xf] }
  0x1f   :  { %s195_s8 = sld [smem:[#allocation2 + $0x2]]  ;;  %s196_s9 = sld [smem:[#allocation2 + $0x3]]  ;;  %v270_v4 = vmov 1983009808   ;;  %v44_v6 = vld [vmem:[#allocation6 + $0x4] sm:$0xf] }
  0x20   :  { %v60_v1 = vshrl.u32 %v59_v0, 7  ;;  %v69_v5 = vunpack.c.l.s4 %v270_v4  ;;  %v49_v7 = vld [vmem:[#allocation6 + $0x8] sm:$0xf]  ;;  %v54_v15 = vld [vmem:[#allocation6 + $0xc] sm:$0xf]  ;;  %vm94_vm0 = vcmask 1041408  }
  0x21   :  { %vm168_vm1 = vcmask 7168   ;;  %vm170_vm2 = vcmask 15360   ;;  %vm172_vm3 = vcmask 23552   ;;  %s271_s1 = smov [#allocation7]   ;;  %vm176_vm4 = vcmask 25600  }
  0x22   :  { %v61_v8 = vsub.s32 0, %v60_v1  ;;  %v65_v9 = vsub.s32 1, %v60_v1  ;;  %v70_v11 = vunpack.c.0.s8 %v69_v5  ;;  %s184_s2 = sshll.u32 %s271_s1, 4  ;;  %s185_s2 = int_to_ptr.vmem [resolvable:$true] %s184_s2 }
  0x23   :  { %s240_s12 = scalar_lea.vmem %s185_s2, 32  ;;  %p245_p12 = scmp.lt.s32.totalorder %s185_s2, %s185_s2 }
  0x24   :  { %v41_v10 = vstv %s39_s6  ;;  %v45_v13 = vstv %s194_s7  ;;  %v62_v16 = vrot.slane %v38_v2, %v61_v8  ;;  %v66_v20 = vrot.slane %v38_v2, %v65_v9  ;;  %p241_p11 = scmp.ne.s32.totalorder %s185_s2, %s240_s12  ;;  %p246_p13 = scmp.lt.s32.totalorder %s240_s12, %s240_s12 }
  0x25   :  { %v42_v12 = vmul.f32 %v41_v10, %v40_v3  ;;  %v50_v14 = vstv %s195_s8  ;;  %v46_v17 = vmul.f32 %v45_v13, %v44_v6  ;;  %v55_v19 = vstv %s196_s9 }
  0x26   :  { %v51_v18 = vmul.f32 %v50_v14, %v49_v7  ;;  %v73_v21 = vsub.s32 %v70_v11, %v60_v1  ;;  %v56_v23 = vmul.f32 %v55_v19, %v54_v15  ;;  %v67_v24 = vcombine.low %v62_v16, %v66_v20  ;;  %p247_p0 = por %p246_p13, %p245_p12 }
  0x27   :  { %v47_v22 = vadd.f32 %v46_v17, %v42_v12 }
  0x28   :  { %v74_v26 = vrot.slane %v67_v24, %v73_v21  ;;  %p248_p1 = pnand %p247_p0, %p241_p11 }
  0x29   :  { %v52_v25 = vadd.f32 %v51_v18, %v47_v22 }
  0x2b   :  { %v57_v27 = vadd.f32 %v56_v23, %v52_v25 }
  0x2d   :  { %v76_v28 = vadd.f32 %v74_v26, %v57_v27 }
  0x2f   :  { %v197_v29 = vmul.f32 -1.442695, %v76_v28 }
  0x31   :  { %202 = vpow2.f32 %v197_v29 }
  0x3b   :  { %v203_v30 = vpop.eup %202 }
  0x3c   :  { %v80_v31 = vadd.f32 1.0, %v203_v30 }
  0x3e   :  { %204 = vrcp.f32 %v80_v31 }
  0x48   :  { %v205_v32 = vpop.eup %204 }
  0x49   :  { %v90_v33 = vrot.slane %v205_v32, %v73_v21  ;;  %v117_v34 = vmul.f32 %v205_v32, %v44_v6  ;;  %v100_v35 = vmul.f32 %v205_v32, %v40_v3  ;;  %v134_v36 = vmul.f32 %v205_v32, %v49_v7 }
  0x4a   :  { %v151_v37 = vmul.f32 %v205_v32, %v54_v15 }
  0x4b   :  { %v91_v38 = vcombine.high %v90_v33, %v90_v33  ;;  %v95_v39 = vsel %vm94_vm0, %v90_v33, 0.0  ;;  %v125_v40 = vrot.slane %v117_v34, %v73_v21  ;;  %v108_v41 = vrot.slane %v100_v35, %v73_v21 }
  0x4c   :  { %v142_v42 = vrot.slane %v134_v36, %v73_v21  ;;  %v159_v43 = vrot.slane %v151_v37, %v73_v21 }
  0x4d   :  { %v96_v44 = vsel %vm94_vm0, %v91_v38, 0.0  ;;  %v126_v45 = vcombine.high %v125_v40, %v125_v40  ;;  %v129_v46 = vsel %vm94_vm0, %v125_v40, 0.0  ;;  %v109_v47 = vcombine.high %v108_v41, %v108_v41 }
  0x4e   :  { %v97_v48 = vadd.f32 %v96_v44, %v95_v39  ;;  %v112_v49 = vsel %vm94_vm0, %v108_v41, 0.0  ;;  %v143_v50 = vcombine.high %v142_v42, %v142_v42  ;;  %v146_v53 = vsel %vm94_vm0, %v142_v42, 0.0 }
  0x4f   :  { %v130_v51 = vsel %vm94_vm0, %v126_v45, 0.0  ;;  %v113_v52 = vsel %vm94_vm0, %v109_v47, 0.0  ;;  %v160_v54 = vcombine.high %v159_v43, %v159_v43  ;;  %v163_v58 = vsel %vm94_vm0, %v159_v43, 0.0 }
  0x50   :  { %98 = vadd.xlane.f32.xlu0 %v97_v48  ;;  %v131_v55 = vadd.f32 %v130_v51, %v129_v46  ;;  %v114_v56 = vadd.f32 %v113_v52, %v112_v49  ;;  %v147_v57 = vsel %vm94_vm0, %v143_v50, 0.0 }
  0x51   :  { %v164_v59 = vsel %vm94_vm0, %v160_v54, 0.0  ;;  %v148_v60 = vadd.f32 %v147_v57, %v146_v53 }
  0x52   :  { %132 = vadd.xlane.f32.xlu1 %v131_v55  ;;  %v165_v61 = vadd.f32 %v164_v59, %v163_v58 }
  0x54   :  { %115 = vadd.xlane.f32.xlu0 %v114_v56 }
  0x56   :  { %149 = vadd.xlane.f32.xlu1 %v148_v60 }
  0x58   :  { %166 = vadd.xlane.f32.xlu0 %v165_v61 }
  0xdd   :  { %v99_v62 = vpop.xlane.xlu0 %98 }
  0xde   :  { %206 = vrcp.f32 %v99_v62 }
  0xdf   :  { %v133_v63 = vpop.xlane.xlu1 %132 }
  0xe1   :  { %v116_v0 = vpop.xlane.xlu0 %115 }
  0xe2   :  { %v169_v1 = vsel %vm168_vm1, %v116_v0, %v133_v63 }
  0xe3   :  { %v150_v2 = vpop.xlane.xlu1 %149 }
  0xe4   :  { %v171_v3 = vsel %vm170_vm2, %v169_v1, %v150_v2 }
  0xe5   :  { %v167_v4 = vpop.xlane.xlu0 %166 }
  0xe6   :  { %v173_v6 = vsel %vm172_vm3, %v171_v3, %v167_v4 }
  0xe8   :  { %v207_v5 = vpop.eup %206 }
  0xe9   :  { %v175_v7 = vmul.f32 %v207_v5, %v173_v6 }
  0xeb   :  { %177 = vst.msk [vmem:[#allocation7] sm:$0x3] %vm176_vm4, %v175_v7 }
  0xec   :  { %251 = shalt.err (!%p248_p1)
}
  0xed   :  { %s252_s15 = scalar_lea.hbm %s344_s3, 32 }
  0xee   :  { %p253_p2 = scmp.ne.s32.totalorder %s344_s3, %s252_s15  ;;  %p256_p3 = scmp.lt.u32.totalorder %s252_s15, %s344_s3 }
  0xf0   :  { %p258_p4 = pnand %p256_p3, %p253_p2 }
  0xf2   :  { %261 = shalt.err (!%p258_p4)
}
  0xf3   :  { %187 = dma.vmem_to_hbm [thread:$0]  %s185_s2, 32, %s344_s3, [#allocation4]  }
  0xf4   :  { %266 = dma.done.wait [#allocation4], 32  }
  0xf5   :  { %267 = vsyncadd [#allocation4], 4294967264 }
  0xf6   :  { %191 = vsyncpa [#allocation3], 1 }
  0xf7   :  { %192 = vsyncpa [#allocation4], 1 }
  0xf8   :  { %193 = vsyncpa [#allocation5], 1 }

</bundles_post_ra>
